<compile_context>
chip_gen: v6e
topology: v6e:2x2x1
jax: 0.10.0
libtpu: 0.0.40
codegen_flags: <defaults>
</compile_context>

<pallas_src>
import jax
import jax.numpy as jnp
import numpy as np
from jax.experimental import pallas as pl
from jax.experimental.pallas import tpu as pltpu


def _cdiv(a, b):
    return -(-a // b)


def _pad_to(x, m):
    return _cdiv(x, m) * m


def _skip_conv_kernel(x1_ref, x2_ref, w1_ref, w2_ref, b_ref, o_ref):
    # x1_ref: (bn, d1, ts)   x2_ref: (bn, d2, ts)
    # w1_ref: (Cout, d1)     w2_ref: (Cout, d2)     b_ref: (Cout, 1)
    # o_ref:  (bn, Cout, ts) -- lane-dense output (last dim = spatial tile)
    bn = x1_ref.shape[0]
    cout = w1_ref.shape[0]
    w1 = jnp.broadcast_to(w1_ref[...], (bn, cout, w1_ref.shape[1]))
    w2 = jnp.broadcast_to(w2_ref[...], (bn, cout, w2_ref.shape[1]))
    acc = jnp.einsum("bod,bdm->bom", w1, x1_ref[...],
                     preferred_element_type=jnp.float32,
                     precision=jax.lax.Precision.HIGHEST)
    acc = acc + jnp.einsum("bod,bdm->bom", w2, x2_ref[...],
                           preferred_element_type=jnp.float32,
                           precision=jax.lax.Precision.HIGHEST)
    # b_ref is (Cout, 1) -> broadcasts against (bn, Cout, ts).
    o_ref[...] = (acc + b_ref[...]).astype(o_ref.dtype)


def _vmem_capacity_bytes():
    """Physical VMEM per core (generation-aware); conservative fallback = v7x."""
    try:
        info = pltpu.get_tpu_info()
        cap = getattr(info, "vmem_capacity_bytes", None)
        if cap:
            return int(cap)
    except Exception:
        pass
    return 64 * 1024 * 1024


def _choose_tiling(N, M_spatial, d1, d2, Cout, itemsize,
                   data_budget_bytes, target_step_bytes):
    """Pick (batch_block bn, spatial_tile ts) so each grid step moves enough HBM
    traffic to hide the ~0.35us step overhead while fitting the VMEM budget."""
    padded_chan = _pad_to(d1, 8) + _pad_to(d2, 8) + _pad_to(Cout, 8)
    raw_chan = d1 + d2 + Cout
    # Columns per step we'd like (>= ~4 MiB traffic covers v5e/v6e/v7x targets).
    desired_cols = max(128, target_step_bytes // (raw_chan * itemsize))
    # Columns per step the double-buffered VMEM budget allows.
    cap_cols = max(128, data_budget_bytes // (2 * padded_chan * itemsize))
    block_cols = min(desired_cols, cap_cols)

    if M_spatial >= block_cols:
        # Large image: tile the spatial axis, one image per step.
        bn = 1
        n_tiles = _cdiv(M_spatial, block_cols)
        if N * n_tiles < 2 and M_spatial >= 256:
            n_tiles = 2  # keep >= 2 grid steps so both v7x TCs get work
        # Near-even tiling rounded up to a lane multiple (avoids a narrow tail).
        ts = min(M_spatial, _pad_to(_cdiv(M_spatial, n_tiles), 128))
    else:
        # Small image: full spatial extent, block several batch images per step.
        ts = M_spatial
        bn = max(1, min(N, block_cols // max(M_spatial, 1)))
        if N >= 2:
            bn = min(bn, _cdiv(N, 2))  # keep >= 2 grid steps across batch
        bn_cap = max(1, data_budget_bytes //
                     (2 * padded_chan * itemsize * _pad_to(M_spatial, 128)))
        bn = min(bn, bn_cap)
    return bn, ts


def skip_connection_forward(in1, in2, weight, bias):
    """in1: (N, d1, m, m), in2: (N, d2, m, m)   [NCHW, like PyTorch]
    weight: (Cout, Cin) with Cin = d1 + d2  (1x1 conv kernel, squeezed)
    bias:   (Cout,)
    returns: (N, Cout, m, m)  [NCHW]
    """
    N, d1, H, W = in1.shape
    N2, d2, H2, W2 = in2.shape
    assert N2 == N and (H2, W2) == (H, W)
    Cout, Cin = weight.shape
    assert Cin == d1 + d2

    M_spatial = H * W
    out_dtype = in1.dtype
    itemsize = max(jnp.dtype(in1.dtype).itemsize, jnp.dtype(out_dtype).itemsize)

    # Generation-aware VMEM budgeting: 128 MiB on v5e/v6e, 64 MiB on v7x.
    vmem_cap = _vmem_capacity_bytes()
    data_budget = vmem_cap // 2                     # double-buffered data blocks
    vmem_limit = (vmem_cap * 3) // 4                # 96 MiB v5e/v6e, 48 MiB v7x

    bn, ts = _choose_tiling(N, M_spatial, d1, d2, Cout, itemsize,
                            data_budget, target_step_bytes=4 * 1024 * 1024)
    grid = (_cdiv(N, bn), _cdiv(M_spatial, ts))

    # Free reshapes on contiguous NCHW tensors -- no concat, no transpose in HBM.
    x1 = in1.reshape(N, d1, M_spatial)
    x2 = in2.reshape(N, d2, M_spatial)
    w1 = weight[:, :d1]                  # (Cout, d1)
    w2 = weight[:, d1:]                  # (Cout, d2)
    b_col = bias.reshape(Cout, 1)

    in_elem = jnp.dtype(in1.dtype).itemsize
    out_elem = jnp.dtype(out_dtype).itemsize
    cost = pl.CostEstimate(
        flops=int(2 * N * M_spatial * Cin * Cout),
        transcendentals=0,
        bytes_accessed=int(N * M_spatial * (d1 + d2) * in_elem
                           + N * M_spatial * Cout * out_elem
                           + weight.size * jnp.dtype(weight.dtype).itemsize
                           + bias.size * jnp.dtype(bias.dtype).itemsize),
    )

    out_flat = pl.pallas_call(
        _skip_conv_kernel,
        out_shape=jax.ShapeDtypeStruct((N, Cout, M_spatial), out_dtype),
        grid_spec=pltpu.PrefetchScalarGridSpec(
            num_scalar_prefetch=0,
            grid=grid,
            in_specs=[
                # Inputs: bn batch images, full channel extent, large spatial tile.
                pl.BlockSpec((bn, d1, ts), lambda nb, j: (nb, 0, j)),
                pl.BlockSpec((bn, d2, ts), lambda nb, j: (nb, 0, j)),
                # Weights / bias: constant-indexed -> stay VMEM-resident.
                pl.BlockSpec((Cout, d1), lambda nb, j: (0, 0)),
                pl.BlockSpec((Cout, d2), lambda nb, j: (0, 0)),
                pl.BlockSpec((Cout, 1), lambda nb, j: (0, 0)),
            ],
            out_specs=pl.BlockSpec((bn, Cout, ts), lambda nb, j: (nb, 0, j)),
        ),
        compiler_params=pltpu.CompilerParams(
            dimension_semantics=("parallel", "parallel"),
            vmem_limit_bytes=int(vmem_limit),
        ),
        cost_estimate=cost,
    )(x1, x2, w1, w2, b_col)

    # (N, Cout, m*m) -> (N, Cout, m, m): free reshape, already NCHW.
    return out_flat.reshape(N, Cout, H, W)


if __name__ == "__main__":
    # Small shapes consistent with the module: N=2, d1=4, d2=4, m=16, out=16.
    N, d1, d2, m = 2, 4, 4, 16
    in_features = d1 + d2
    out_features = 16

    key = jax.random.PRNGKey(0)
    k1, k2, kw, kb = jax.random.split(key, 4)

    in1 = jax.random.normal(k1, (N, d1, m, m), dtype=jnp.float32)
    in2 = jax.random.normal(k2, (N, d2, m, m), dtype=jnp.float32)

    # Deterministic parameter init mimicking nn.Conv2d defaults:
    # fan_in = in_features * 1 * 1.
    bound = 1.0 / np.sqrt(in_features)
    weight = jax.random.uniform(kw, (out_features, in_features),
                                minval=-bound, maxval=bound, dtype=jnp.float32)
    bias = jax.random.uniform(kb, (out_features,),
                              minval=-bound, maxval=bound, dtype=jnp.float32)

    out = skip_connection_forward(in1, in2, weight, bias)
    out = jax.block_until_ready(out)

    # Pure-JAX reference check of the concat + 1x1-conv semantics.
    x_cat = jnp.concatenate((in1, in2), axis=1)
    ref = jnp.einsum("ncHW,oc->noHW", x_cat, weight,
                     precision=jax.lax.Precision.HIGHEST) + bias[None, :, None, None]
    np.testing.assert_allclose(np.asarray(out), np.asarray(ref), rtol=1e-5, atol=1e-5)

    assert out.shape == (N, out_features, m, m)
    print("KERNEL_OK")
</pallas_src>

<mosaic_0001>
module attributes {stable_mosaic.version = 11 : i64} {
  func.func @_skip_conv_kernel(%arg0: i32, %arg1: i32, %arg2: memref<1x4x256xf32, #tpu.memory_space<vmem>>, %arg3: memref<1x4x256xf32, #tpu.memory_space<vmem>>, %arg4: memref<16x4xf32, #tpu.memory_space<vmem>>, %arg5: memref<16x4xf32, #tpu.memory_space<vmem>>, %arg6: memref<16x1xf32, #tpu.memory_space<vmem>>, %arg7: memref<1x16x256xf32, #tpu.memory_space<vmem>>) attributes {dimension_semantics = [#tpu.dimension_semantics<parallel>, #tpu.dimension_semantics<parallel>], iteration_bounds = array<i64: 2, 1>, scalar_prefetch = 0 : i64, scratch_operands = 0 : i64, tpu.core_type = #tpu.core_type<tc>, window_params = [{transform_indices = @transform_0, window_bounds = array<i64: 1, 4, 256>}, {transform_indices = @transform_1, window_bounds = array<i64: 1, 4, 256>}, {pipeline_mode = #tpu.pipeline_mode<synchronous>, transform_indices = @transform_2, window_bounds = array<i64: 16, 4>}, {pipeline_mode = #tpu.pipeline_mode<synchronous>, transform_indices = @transform_3, window_bounds = array<i64: 16, 4>}, {pipeline_mode = #tpu.pipeline_mode<synchronous>, transform_indices = @transform_4, window_bounds = array<i64: 16, 1>}, {transform_indices = @transform_5, window_bounds = array<i64: 1, 16, 256>}]} {
    %c0 = arith.constant 0 : index
    %c0_0 = arith.constant 0 : index
    %0 = vector.load %arg4[%c0, %c0_0] : memref<16x4xf32, #tpu.memory_space<vmem>>, vector<16x4xf32>
    %1 = vector.shape_cast %0 : vector<16x4xf32> to vector<1x16x4xf32>
    %c0_1 = arith.constant 0 : index
    %c0_2 = arith.constant 0 : index
    %2 = vector.load %arg5[%c0_1, %c0_2] : memref<16x4xf32, #tpu.memory_space<vmem>>, vector<16x4xf32>
    %3 = vector.shape_cast %2 : vector<16x4xf32> to vector<1x16x4xf32>
    %c0_3 = arith.constant 0 : index
    %c0_4 = arith.constant 0 : index
    %c0_5 = arith.constant 0 : index
    %4 = vector.load %arg2[%c0_3, %c0_4, %c0_5] : memref<1x4x256xf32, #tpu.memory_space<vmem>>, vector<1x4x256xf32>
    "tpu.trace_start"() <{level = 10 : i32, message = "bod,bdm->bom"}> : () -> ()
    %cst = arith.constant dense<0.000000e+00> : vector<1x16x256xf32>
    %5 = tpu.matmul %1, %4, %cst {dimension_numbers = #tpu.dot_dimension_numbers<[2], [1], [1], [2], [0, 0, 0, 1, 1, 2], [0], [0]>, precision = #tpu.contract_precision<fp32>} : vector<1x16x4xf32>, vector<1x4x256xf32>, vector<1x16x256xf32> -> vector<1x16x256xf32>
    "tpu.trace_stop"() : () -> ()
    %c0_6 = arith.constant 0 : index
    %c0_7 = arith.constant 0 : index
    %c0_8 = arith.constant 0 : index
    %6 = vector.load %arg3[%c0_6, %c0_7, %c0_8] : memref<1x4x256xf32, #tpu.memory_space<vmem>>, vector<1x4x256xf32>
    "tpu.trace_start"() <{level = 10 : i32, message = "bod,bdm->bom"}> : () -> ()
    %cst_9 = arith.constant dense<0.000000e+00> : vector<1x16x256xf32>
    %7 = tpu.matmul %3, %6, %cst_9 {dimension_numbers = #tpu.dot_dimension_numbers<[2], [1], [1], [2], [0, 0, 0, 1, 1, 2], [0], [0]>, precision = #tpu.contract_precision<fp32>} : vector<1x16x4xf32>, vector<1x4x256xf32>, vector<1x16x256xf32> -> vector<1x16x256xf32>
    "tpu.trace_stop"() : () -> ()
    %8 = arith.addf %5, %7 : vector<1x16x256xf32>
    %c0_10 = arith.constant 0 : index
    %c0_11 = arith.constant 0 : index
    %9 = vector.load %arg6[%c0_10, %c0_11] : memref<16x1xf32, #tpu.memory_space<vmem>>, vector<16x1xf32>
    %10 = vector.shape_cast %9 : vector<16x1xf32> to vector<1x16x1xf32>
    %11 = vector.broadcast %10 : vector<1x16x1xf32> to vector<1x16x256xf32>
    %12 = arith.addf %8, %11 : vector<1x16x256xf32>
    %c0_12 = arith.constant 0 : index
    %c0_13 = arith.constant 0 : index
    %c0_14 = arith.constant 0 : index
    %13 = vector.load %arg7[%c0_12, %c0_13, %c0_14] : memref<1x16x256xf32, #tpu.memory_space<vmem>>, vector<1x16x256xf32>
    tpu.vector_store %arg7[%c0_12, %c0_13, %c0_14], %12 {strides = array<i32>} : memref<1x16x256xf32, #tpu.memory_space<vmem>>, vector<1x16x256xf32>,
    return
  }
  func.func @transform_0(%arg0: i32, %arg1: i32) -> (i32, i32, i32) {
    %c0_i32 = arith.constant 0 : i32
    %c0_i32_0 = arith.constant 0 : i32
    return %arg0, %c0_i32, %arg1 : i32, i32, i32
  }
  func.func @transform_1(%arg0: i32, %arg1: i32) -> (i32, i32, i32) {
    %c0_i32 = arith.constant 0 : i32
    %c0_i32_0 = arith.constant 0 : i32
    return %arg0, %c0_i32, %arg1 : i32, i32, i32
  }
  func.func @transform_2(%arg0: i32, %arg1: i32) -> (i32, i32) {
    %c0_i32 = arith.constant 0 : i32
    %c0_i32_0 = arith.constant 0 : i32
    %c0_i32_1 = arith.constant 0 : i32
    return %c0_i32, %c0_i32_0 : i32, i32
  }
  func.func @transform_3(%arg0: i32, %arg1: i32) -> (i32, i32) {
    %c0_i32 = arith.constant 0 : i32
    %c0_i32_0 = arith.constant 0 : i32
    %c0_i32_1 = arith.constant 0 : i32
    return %c0_i32, %c0_i32_0 : i32, i32
  }
  func.func @transform_4(%arg0: i32, %arg1: i32) -> (i32, i32) {
    %c0_i32 = arith.constant 0 : i32
    %c0_i32_0 = arith.constant 0 : i32
    %c0_i32_1 = arith.constant 0 : i32
    return %c0_i32, %c0_i32_0 : i32, i32
  }
  func.func @transform_5(%arg0: i32, %arg1: i32) -> (i32, i32, i32) {
    %c0_i32 = arith.constant 0 : i32
    %c0_i32_0 = arith.constant 0 : i32
    return %arg0, %c0_i32, %arg1 : i32, i32, i32
  }
}

</mosaic_0001>

<bundles_post_ra>
// kernel: tpu_custom_call.1
= control target key start
LH: loop header
LB: loop body
LE: loop exit
PB: predicated region body
PF: predicated region fallthrough
CT: control target
= control target key end

     0   :  { %10 = vsyncpa [#allocation3], 0  ;;  %s1901_s0 = inlined_call_operand.vmem [shape: f32[2,4,256], index: 0, kind: input, shape index: {}]   ;;  %s1902_s1 = inlined_call_operand.vmem [shape: f32[2,4,256], index: 1, kind: input, shape index: {}]   ;;  %s1903_s2 = inlined_call_operand.vmem [shape: f32[16,4], index: 2, kind: input, shape index: {}]   ;;  %s1904_s3 = inlined_call_operand.vmem [shape: f32[16,4], index: 3, kind: input, shape index: {}]   ;;  %s1905_s4 = inlined_call_operand.vmem [shape: f32[16,1], index: 4, kind: input, shape index: {}]   ;;  %s1906_s5 = inlined_call_operand.hbm [shape: f32[2,16,256], index: 5, kind: output, shape index: {}]  }
   0x1   :  { %12 = vsyncpa [#allocation3 + $0x1], 0  ;;  %s1676_s18 = smov 0   ;;  %s1678_s19 = smov 0  }
   0x2   :  { %s1680_s20 = smov 0   ;;  %s1682_s21 = smov 0  }
   0x3   :  { %s1684_s22 = smov 0   ;;  %s1686_s23 = smov 0  }
   0x4 LB: > { %s1483_s24 = sadd.s32 4294967295, %s1639_s23   ;;  %s1484_s25 = sadd.s32 4294967294, %s1639_s23   ;;  %s1639_s23 = sphi %s1686_s23, %s18_s23   ;;  %s1635_s22 = sphi %s1684_s22, %s1913_s22   ;;  %s1631_s21 = sphi %s1682_s21, %s1912_s21   ;;  %s1627_s20 = sphi %s1680_s20, %s1911_s20   ;;  %s1623_s19 = sphi %s1678_s19, %s1910_s19   ;;  %s1619_s18 = sphi %s1676_s18, %s1909_s18  }
   0x5   : > { %s30_s26 = sadd.s32 1, %s1635_s22  ;;  %s158_s27 = sadd.s32 1, %s1627_s20 }
   0x6   : > { %p32_p0 = scmp.ge.s32.totalorder %s30_s26, 2  ;;  %p168_p1 = scmp.ne.s32.totalorder %s1627_s20, %s1623_s19 }
   0x7   : > { %p169_p2 = scmp.eq.s32.totalorder %s1483_s24, 1  ;;  %p174_p3 = scmp.ne.s32.totalorder %s1623_s19, %s1619_s18 }
   0x8   : > { %s1915_s26 = smov (%p32_p0, %s30_s26), 0  ;;  %p175_p5 = scmp.eq.s32.totalorder %s1484_s25, 1 }
   0x9   : > { %p1716_p4 = por %p169_p2, %p168_p1  ;;  %s153_s29 = ssub.s32 %s1635_s22, %s1915_s26 }
   0xa   : > { %p1487_p6 = scmp.ge.s32.totalorder %s1639_s23, 1  ;;  %p156_p7 = scmp.eq.s32.totalorder %s153_s29, 0 }
   0xb   : > { %p1723_p8 = por %p175_p5, %p174_p3  ;;  %p228_p9 = scmp.lt.s32.totalorder %s1639_s23, 3 }
   0xc   : > { %s1729_s6 = scalar_select %p156_p7, %s1627_s20, %s158_s27  }
   0xd   : > { %p229_p10 = pnand %p1487_p6, %p228_p9 }
   0xe   : > { %p270_p11 = scmp.lt.s32.totalorder (!%p229_p10), %s1631_s21, 1  ;;  %s266_s12 = sand.u32 (!%p229_p10), 1, %s1623_s19  }
   0xf   : > { %232 = sbr.rel (%p229_p10) target bundleno = 297 (0x129), region = 40  ;;  %s1500_s16 = sshll.u32 (!%p229_p10), %s1631_s21, 9 }
  0x10   : > { %s1643_s29 = smov (!%p229_p10), [#allocation2]  }
  0x14   : > { %v292_v0 = vld [vmem:[%s1904_s3] sm:$0xff]  ;;  %vm298_vm0 = vcmask 31744   ;;  %v293_v1 = vld [vmem:[%s1904_s3 + $0x8] sm:$0xff]  ;;  %v1641_v2 = vmov 0.0   ;;  %s271_s13 = scalar_select %p270_p11, %s1631_s21, 1  ;;  %v1642_v8 = vmov 0  }
  0x15   : > { %376 = vmatprep.mubr.f32.mxu0 %v1641_v2  ;;  %v300_v3 = vsel %vm298_vm0, %v292_v0, 0  ;;  %v303_v4 = vsel %vm298_vm0, %v293_v1, 0  ;;  %473 = vmatprep.mubr.f32.mxu1 %v1641_v2  ;;  %v1350_v5 = vld [vmem:[%s1905_s4] sm:$0xff]  ;;  %vm305_vm1 = vcmask 1043456   ;;  %v1351_v11 = vld [vmem:[%s1905_s4 + $0x8] sm:$0xff]  ;;  %s1856_s21 = scalar_lea.sflag [#allocation3], %s266_s12 }
  0x16   : > { %v1746_v6 = vand.u32 4294901760, %v300_v3  ;;  %v1748_v7 = vand.u32 4294901760, %v303_v4  ;;  %1560 = vset.pattern.permute.xlu0 %v1642_v8  ;;  %s1498_s14 = sshll.u32 %s271_s13, 3  ;;  %v290_v30 = vld [vmem:[%s1903_s2] sm:$0xff]  ;;  %v291_v39 = vld [vmem:[%s1903_s2 + $0x8] sm:$0xff]  ;;  %s1488_s13 = sshll.u32 %s266_s12, 5 }
  0x17   : > { %1354 = vperm.xlu0 %1560, %v1350_v5   ;;  %s287_s25 = scalar_lea.vmem %s1902_s1, %s1498_s14  ;;  %s277_s7 = scalar_lea.vmem %s1901_s0, %s1498_s14  ;;  %v827_v36 = vsel %vm298_vm0, %v290_v30, 0  ;;  %v830_v43 = vsel %vm298_vm0, %v291_v39, 0 }
  0x18   : > { %v1751_v9 = vsub.f32 %v300_v3, %v1746_v6  ;;  %v1754_v10 = vsub.f32 %v303_v4, %v1748_v7  ;;  %v295_v12 = vld [vmem:[%s287_s25] sm:$0xff]  ;;  %v1791_v42 = vand.u32 4294901760, %v827_v36  ;;  %v1798_v47 = vand.u32 4294901760, %v830_v43  ;;  %s268_s14 = scalar_lea.vmem [#allocation2], %s1488_s13  ;;  %s1852_s25 = scalar_lea.hbm %s1906_s5, %s1500_s16 }
  0x19   : > { %v294_v15 = vld [vmem:[%s277_s7] sm:$0xff]  ;;  %v297_v16 = vcombine.high %v295_v12, %v295_v12  ;;  %v306_v17 = vsel %vm305_vm1, %v295_v12, 0  ;;  %s1386_s15 = sshll.u32 %s268_s14, 4  ;;  %s1567_s7 = sshll.u32 %s1643_s29, 4  ;;  %s1847_s15 = int_to_ptr.vmem [resolvable:$true] %s1386_s15  ;;  %s1568_s7 = int_to_ptr.vmem [resolvable:$false] %s1567_s7 }
  0x1a   : > { %v379_v13 = vand.u32 4294901760, %v1751_v9  ;;  %v390_v14 = vand.u32 4294901760, %v1754_v10  ;;  %v825_v18 = vcombine.high %v294_v15, %v294_v15  ;;  %v342_v19 = vand.u32 4294901760, %v306_v17  ;;  %s1563_s27 = scalar_lea.vmem %s1847_s15, 512  ;;  %s1569_s8 = scalar_lea.vmem %s1568_s7, 1024 }
  0x1b   : > { %1359 = vperm.xlu0 %1560, %v1351_v11   ;;  %v308_v21 = vsel %vm305_vm1, %v297_v16, 0  ;;  %v832_v35 = vsel %vm305_vm1, %v294_v15, 0  ;;  %v904_v46 = vsub.f32 %v827_v36, %v1791_v42  ;;  %v915_v51 = vsub.f32 %v830_v43, %v1798_v47  ;;  %p1564_p12 = scmp.ne.s32.totalorder %s1847_s15, %s1563_s27  ;;  %p1570_p1 = scmp.lt.s32.totalorder %s1847_s15, %s1568_s7 }
  0x1c   : > { %v380_v20 = vsub.f32 %v1751_v9, %v379_v13  ;;  %v391_v22 = vsub.f32 %v1754_v10, %v390_v14  ;;  %v340_v23 = vand.u32 4294901760, %v308_v21  ;;  %v436_v25 = vsub.f32 %v306_v17, %v342_v19  ;;  %p1571_p2 = scmp.lt.s32.totalorder %s1569_s8, %s1563_s27 }
  0x1d   : > { %v834_v26 = vsel %vm305_vm1, %v825_v18, 0  ;;  %v1789_v41 = vand.u32 4294901760, %v832_v35  ;;  %v905_v50 = vand.u32 4294901760, %v904_v46  ;;  %v916_v55 = vand.u32 4294901760, %v915_v51  ;;  %p1565_p13 = pnand %p1564_p12, %p1716_p4 }
  0x1e   : > { %v381_v24 = vand.u32 4294901760, %v380_v20  ;;  %341 = vmatprep.subr.mxu0 %v340_v23  ;;  %v430_v27 = vsub.f32 %v308_v21, %v340_v23  ;;  %v437_v28 = vand.u32 4294901760, %v436_v25  ;;  %v1776_v29 = vand.u32 4294901760, %v834_v26  ;;  %p1572_p3 = por %p1571_p2, %p1570_p1 }
  0x1f   : > { %343 = vmatpush1.msra.mxu0 %v342_v19  ;;  %v392_v31 = vand.u32 4294901760, %v391_v22  ;;  %v962_v45 = vsub.f32 %v832_v35, %v1789_v41  ;;  %v906_v54 = vsub.f32 %v904_v46, %v905_v50  ;;  %v917_v58 = vsub.f32 %v915_v51, %v916_v55  ;;  %p1566_p0 = pneg %p1565_p13 }
  0x20   : > { %382 = vmatmul.mubr.f32.vlgmr.msra.gmra.mxu0 %v381_v24  ;;  %v431_v32 = vand.u32 4294901760, %v430_v27  ;;  %520 = vmatprep.subr.mxu0 %v430_v27  ;;  %v438_v33 = vsub.f32 %v436_v25, %v437_v28  ;;  %v956_v38 = vsub.f32 %v834_v26, %v1776_v29 }
  0x21   : > { %387 = vmatprep.mubr.f32.mxu0 %v1641_v2  ;;  %523 = vmatpush1.msra.mxu0 %v436_v25  ;;  %v963_v49 = vand.u32 4294901760, %v962_v45  ;;  %v907_v57 = vand.u32 4294901760, %v906_v54  ;;  %v918_v59 = vand.u32 4294901760, %v917_v58  ;;  %p1573_p5 = pnand %p1572_p3, %p1566_p0 }
  0x22   : > { %v432_v34 = vsub.f32 %v430_v27, %v431_v32  ;;  %691 = vmatprep.subr.mxu0 %v431_v32  ;;  %v439_v37 = vand.u32 4294901760, %v438_v33  ;;  %v957_v44 = vand.u32 4294901760, %v956_v38 }
  0x23   : > { %v964_v53 = vsub.f32 %v962_v45, %v963_v49 }
  0x24   : > { %393 = vmatmul.mubr.f32.gmra.mxu0 %v392_v31  ;;  %v433_v40 = vand.u32 4294901760, %v432_v34  ;;  %v958_v48 = vsub.f32 %v956_v38, %v957_v44 }
  0x25   : > { %556 = vmatprep.mubr.f32.mxu0 %v1641_v2  ;;  %v965_v56 = vand.u32 4294901760, %v964_v53 }
  0x26   : > { %434 = vmatprep.subr.mxu1 %v433_v40  ;;  %v959_v52 = vand.u32 4294901760, %v958_v48 }
  0x27   : > { %440 = vmatpush1.msra.mxu1 %v439_v37 }
  0x28   : > { %475 = vmatmul.mubr.f32.vlgmr.msra.gmra.mxu1 %v1746_v6  ;;  %604 = vmatprep.subr.mxu1 %v340_v23 }
  0x29   : > { %606 = vmatpush1.msra.mxu1 %v342_v19  ;;  %559 = vmatmul.mubr.f32.vlgmr.msra.gmra.mxu0 %v1751_v9 }
  0x2a   : > { %480 = vmatprep.mubr.f32.mxu1 %v1641_v2  ;;  %564 = vmatprep.mubr.f32.mxu0 %v1641_v2 }
  0x2b   : > { %695 = vmatpush1.msra.mxu0 %v437_v28  ;;  %774 = vmatprep.subr.mxu1 %v340_v23 }
  0x2c   : > { %482 = vmatmul.mubr.f32.gmra.mxu1 %v1748_v7  ;;  %867 = vmatprep.subr.mxu0 %v1776_v29 }
  0x2d   : > { %567 = vmatmul.mubr.f32.gmra.mxu0 %v1754_v10  ;;  %639 = vmatprep.mubr.f32.mxu1 %v1641_v2 }
  0x2e   : > { %728 = vmatprep.mubr.f32.mxu0 %v1641_v2 }
  0x30   : > { %643 = vmatmul.mubr.f32.vlgmr.msra.gmra.mxu1 %v379_v13 }
  0x31   : > { %776 = vmatpush1.msra.mxu1 %v342_v19  ;;  %730 = vmatmul.mubr.f32.vlgmr.msra.gmra.mxu0 %v1746_v6 }
  0x32   : > { %648 = vmatprep.mubr.f32.mxu1 %v1641_v2  ;;  %735 = vmatprep.mubr.f32.mxu0 %v1641_v2 }
  0x33   : > { %869 = vmatpush1.msra.mxu0 %v1789_v41  ;;  %960 = vmatprep.subr.mxu1 %v959_v52 }
  0x34   : > { %652 = vmatmul.mubr.f32.gmra.mxu1 %v390_v14  ;;  %1046 = vmatprep.subr.mxu0 %v956_v38 }
  0x35   : > { %737 = vmatmul.mubr.f32.gmra.mxu0 %v1748_v7  ;;  %809 = vmatprep.mubr.f32.mxu1 %v1641_v2 }
  0x36   : > { %902 = vmatprep.mubr.f32.mxu0 %v1641_v2 }
  0x38   : > { %811 = vmatmul.mubr.f32.vlgmr.msra.gmra.mxu1 %v1746_v6 }
  0x39   : > { %966 = vmatpush1.msra.mxu1 %v965_v56  ;;  %908 = vmatmul.mubr.f32.vlgmr.msra.gmra.mxu0 %v907_v57 }
  0x3a   : > { %816 = vmatprep.mubr.f32.mxu1 %v1641_v2  ;;  %913 = vmatprep.mubr.f32.mxu0 %v1641_v2 }
  0x3b   : > { %1049 = vmatpush1.msra.mxu0 %v962_v45  ;;  %1130 = vmatprep.subr.mxu1 %v1776_v29 }
  0x3c   : > { %818 = vmatmul.mubr.f32.gmra.mxu1 %v1748_v7  ;;  %1217 = vmatprep.subr.mxu0 %v957_v44 }
  0x3d   : > { %919 = vmatmul.mubr.f32.gmra.mxu0 %v918_v59  ;;  %999 = vmatprep.mubr.f32.mxu1 %v1641_v2 }
  0x3e   : > { %1082 = vmatprep.mubr.f32.mxu0 %v1641_v2 }
  0x40   : > { %1001 = vmatmul.mubr.f32.vlgmr.msra.gmra.mxu1 %v1791_v42 }
  0x41   : > { %1132 = vmatpush1.msra.mxu1 %v1789_v41  ;;  %1085 = vmatmul.mubr.f32.vlgmr.msra.gmra.mxu0 %v904_v46 }
  0x42   : > { %1006 = vmatprep.mubr.f32.mxu1 %v1641_v2  ;;  %1090 = vmatprep.mubr.f32.mxu0 %v1641_v2 }
  0x43   : > { %1221 = vmatpush1.msra.mxu0 %v963_v49  ;;  %1300 = vmatprep.subr.mxu1 %v1776_v29 }
  0x44   : > { %1008 = vmatmul.mubr.f32.gmra.mxu1 %v1798_v47 }
  0x45   : > { %1093 = vmatmul.mubr.f32.gmra.mxu0 %v915_v51  ;;  %1165 = vmatprep.mubr.f32.mxu1 %v1641_v2 }
  0x46   : > { %1254 = vmatprep.mubr.f32.mxu0 %v1641_v2 }
  0x48   : > { %1169 = vmatmul.mubr.f32.vlgmr.msra.gmra.mxu1 %v905_v50 }
  0x49   : > { %1302 = vmatpush1.msra.mxu1 %v1789_v41  ;;  %1256 = vmatmul.mubr.f32.vlgmr.msra.gmra.mxu0 %v1791_v42 }
  0x4a   : > { %1174 = vmatprep.mubr.f32.mxu1 %v1641_v2  ;;  %1261 = vmatprep.mubr.f32.mxu0 %v1641_v2 }
  0x4c   : > { %1178 = vmatmul.mubr.f32.gmra.mxu1 %v916_v55 }
  0x4d   : > { %1263 = vmatmul.mubr.f32.gmra.mxu0 %v1798_v47  ;;  %1335 = vmatprep.mubr.f32.mxu1 %v1641_v2 }
  0x50   : > { %1337 = vmatmul.mubr.f32.vlgmr.msra.gmra.mxu1 %v1791_v42 }
  0x51   : > { %1342 = vmatprep.mubr.f32.mxu1 %v1641_v2 }
  0x54   : > { %1344 = vmatmul.mubr.f32.gmra.mxu1 %v1798_v47 }
  0xe0   : > { %v383_v60 = vpop.f32.mrf.mxu0 }
  0xe2   : > { %v385_v61 = vpop.f32.mrf.mxu0 }
  0xe4   : > { %v394_v62 = vpop.f32.mrf.mxu0 }
  0xe6   : > { %v396_v63 = vpop.f32.mrf.mxu0 }
  0xe8   : > { %v476_v0 = vpop.f32.mrf.mxu1 }
  0xe9   : > { %v560_v1 = vpop.f32.mrf.mxu0  ;;  %v477_v12 = vadd.f32 %v476_v0, %v383_v60 }
  0xea   : > { %v478_v3 = vpop.f32.mrf.mxu1 }
  0xeb   : > { %v562_v4 = vpop.f32.mrf.mxu0  ;;  %v479_v14 = vadd.f32 %v478_v3, %v385_v61  ;;  %v561_v17 = vadd.f32 %v560_v1, %v477_v12 }
  0xec   : > { %v483_v5 = vpop.f32.mrf.mxu1 }
  0xed   : > { %v568_v6 = vpop.f32.mrf.mxu0  ;;  %v484_v18 = vadd.f32 %v483_v5, %v394_v62  ;;  %v563_v21 = vadd.f32 %v562_v4, %v479_v14 }
  0xee   : > { %v485_v7 = vpop.f32.mrf.mxu1 }
  0xef   : > { %v570_v8 = vpop.f32.mrf.mxu0  ;;  %v486_v22 = vadd.f32 %v485_v7, %v396_v63  ;;  %v569_v26 = vadd.f32 %v568_v6, %v484_v18 }
  0xf0   : > { %v644_v9 = vpop.f32.mrf.mxu1 }
  0xf1   : > { %v731_v10 = vpop.f32.mrf.mxu0  ;;  %v645_v23 = vadd.f32 %v644_v9, %v561_v17  ;;  %v571_v30 = vadd.f32 %v570_v8, %v486_v22 }
  0xf2   : > { %v646_v11 = vpop.f32.mrf.mxu1 }
  0xf3   : > { %v733_v13 = vpop.f32.mrf.mxu0  ;;  %v647_v27 = vadd.f32 %v646_v11, %v563_v21  ;;  %v732_v31 = vadd.f32 %v731_v10, %v645_v23 }
  0xf4   : > { %v653_v2 = vpop.f32.mrf.mxu1 }
  0xf5   : > { %v738_v15 = vpop.f32.mrf.mxu0  ;;  %v654_v32 = vadd.f32 %v653_v2, %v569_v26  ;;  %v734_v35 = vadd.f32 %v733_v13, %v647_v27  ;;  %v1355_v13 = vpop.permute.xlu0 %1354 }
  0xf6   : > { %v655_v16 = vpop.f32.mrf.mxu1 }
  0xf7   : > { %v740_v19 = vpop.f32.mrf.mxu0  ;;  %v656_v36 = vadd.f32 %v655_v16, %v571_v30  ;;  %v739_v40 = vadd.f32 %v738_v15, %v654_v32 }
  0xf8   : > { %v812_v20 = vpop.f32.mrf.mxu1 }
  0xf9   : > { %v909_v24 = vpop.f32.mrf.mxu0  ;;  %v813_v37 = vadd.f32 %v812_v20, %v732_v31  ;;  %v741_v44 = vadd.f32 %v740_v19, %v656_v36 }
  0xfa   : > { %v814_v25 = vpop.f32.mrf.mxu1 }
  0xfb   : > { %v911_v28 = vpop.f32.mrf.mxu0  ;;  %v815_v41 = vadd.f32 %v814_v25, %v734_v35  ;;  %v910_v45 = vadd.f32 %v909_v24, %v813_v37  ;;  %v1360_v25 = vpop.permute.xlu0 %1359 }
  0xfc   : > { %v819_v29 = vpop.f32.mrf.mxu1 }
  0xfd   : > { %v920_v33 = vpop.f32.mrf.mxu0  ;;  %v820_v46 = vadd.f32 %v819_v29, %v739_v40  ;;  %v912_v49 = vadd.f32 %v911_v28, %v815_v41 }
  0xfe   : > { %v821_v34 = vpop.f32.mrf.mxu1 }
  0xff   : > { %v922_v38 = vpop.f32.mrf.mxu0  ;;  %v822_v50 = vadd.f32 %v821_v34, %v741_v44  ;;  %v921_v54 = vadd.f32 %v920_v33, %v820_v46 }
 0x100   : > { %v1002_v39 = vpop.f32.mrf.mxu1 }
 0x101   : > { %v1086_v42 = vpop.f32.mrf.mxu0  ;;  %v1003_v51 = vadd.f32 %v1002_v39, %v910_v45  ;;  %v923_v58 = vadd.f32 %v922_v38, %v822_v50 }
 0x102   : > { %v1004_v43 = vpop.f32.mrf.mxu1 }
 0x103   : > { %v1088_v47 = vpop.f32.mrf.mxu0  ;;  %v1005_v55 = vadd.f32 %v1004_v43, %v912_v49  ;;  %v1087_v59 = vadd.f32 %v1086_v42, %v1003_v51 }
 0x104   : > { %v1009_v48 = vpop.f32.mrf.mxu1 }
 0x105   : > { %v1094_v52 = vpop.f32.mrf.mxu0  ;;  %v1010_v60 = vadd.f32 %v1009_v48, %v921_v54  ;;  %v1089_v63 = vadd.f32 %v1088_v47, %v1005_v55 }
 0x106   : > { %v1011_v53 = vpop.f32.mrf.mxu1 }
 0x107   : > { %v1096_v56 = vpop.f32.mrf.mxu0  ;;  %v1012_v0 = vadd.f32 %v1011_v53, %v923_v58  ;;  %v1095_v5 = vadd.f32 %v1094_v52, %v1010_v60 }
 0x108   : > { %v1170_v57 = vpop.f32.mrf.mxu1 }
 0x109   : > { %v1257_v61 = vpop.f32.mrf.mxu0  ;;  %v1171_v1 = vadd.f32 %v1170_v57, %v1087_v59  ;;  %v1097_v9 = vadd.f32 %v1096_v56, %v1012_v0 }
 0x10a   : > { %v1172_v62 = vpop.f32.mrf.mxu1 }
 0x10b   : > { %v1259_v3 = vpop.f32.mrf.mxu0  ;;  %v1173_v6 = vadd.f32 %v1172_v62, %v1089_v63  ;;  %v1258_v10 = vadd.f32 %v1257_v61, %v1171_v1 }
 0x10c   : > { %v1179_v4 = vpop.f32.mrf.mxu1 }
 0x10d   : > { %v1264_v8 = vpop.f32.mrf.mxu0  ;;  %v1180_v11 = vadd.f32 %v1179_v4, %v1095_v5  ;;  %v1260_v2 = vadd.f32 %v1259_v3, %v1173_v6 }
 0x10e   : > { %v1181_v7 = vpop.f32.mrf.mxu1 }
 0x10f   : > { %v1182_v14 = vadd.f32 %v1181_v7, %v1097_v9  ;;  %v1266_v16 = vpop.f32.mrf.mxu0  ;;  %v1265_v18 = vadd.f32 %v1264_v8, %v1180_v11 }
 0x110   : > { %v1338_v12 = vpop.f32.mrf.mxu1 }
 0x111   : > { %v1339_v15 = vadd.f32 %v1338_v12, %v1258_v10  ;;  %v1267_v22 = vadd.f32 %v1266_v16, %v1182_v14 }
 0x112   : > { %v1340_v17 = vpop.f32.mrf.mxu1 }
 0x113   : > { %v1362_v19 = vadd.f32 %v1355_v13, %v1339_v15  ;;  %v1341_v20 = vadd.f32 %v1340_v17, %v1260_v2 }
 0x114   : > { %v1345_v21 = vpop.f32.mrf.mxu1 }
 0x115   : > { %1366 = vst [vmem:[%s268_s14] sm:$0xff] %v1362_v19  ;;  %v1363_v23 = vadd.f32 %v1355_v13, %v1341_v20  ;;  %v1346_v24 = vadd.f32 %v1345_v21, %v1265_v18 }
 0x116   : > { %v1347_v26 = vpop.f32.mrf.mxu1 }
 0x117   : > { %1367 = vst [vmem:[%s268_s14 + $0x8] sm:$0xff] %v1363_v23  ;;  %v1364_v27 = vadd.f32 %v1360_v25, %v1346_v24  ;;  %v1348_v28 = vadd.f32 %v1347_v26, %v1267_v22 }
 0x119   : > { %1368 = vst [vmem:[%s268_s14 + $0x10] sm:$0xff] %v1364_v27  ;;  %v1365_v29 = vadd.f32 %v1360_v25, %v1348_v28 }
 0x11b   : > { %1369 = vst [vmem:[%s268_s14 + $0x18] sm:$0xff] %v1365_v29 }
 0x11c   : > { %1576 = shalt.err (!%p1573_p5)
}
 0x11d   : > { %s1577_s9 = scalar_lea.hbm %s1852_s25, 512  ;;  %s1581_s12 = scalar_lea.hbm %s1906_s5, 1024 }
 0x11e   : > { %p1578_p6 = scmp.ne.s32.totalorder %s1852_s25, %s1577_s9  ;;  %p1582_p10 = scmp.lt.s32.totalorder %s1852_s25, %s1906_s5 }
 0x11f   : > { %p1583_p11 = scmp.lt.s32.totalorder %s1581_s12, %s1577_s9 }
 0x120   : > { %p1579_p7 = pnand %p1578_p6, %p1716_p4 }
 0x121   : > { %p1584_p12 = por %p1583_p11, %p1582_p10 }
 0x122   : > { %p1580_p9 = pneg %p1579_p7 }
 0x124   : > { %p1585_p13 = pnand %p1584_p12, %p1580_p9 }
 0x126   : > { %1588 = shalt.err (!%p1585_p13)
}
 0x127   : > { %s1644_s16 = smov 256   ;;  %s1645_s17 = smov 16  }
 0x128   : > { %1501 = dma.vmem_to_hbm [thread:$0]  (%p1716_p4), %s1847_s15, 512, %s1852_s25, %s1856_s21, %s1644_s16, %s1644_s16, %s1645_s17  }
 0x129 PF: > { %p1507_p0 = scmp.ge.s32.totalorder %s1639_s23, 2  ;;  %s1401_s24 = sand.u32 1, %s1619_s18  }
 0x12a   : > { %s1402_s27 = scalar_lea.sflag [#allocation3], %s1401_s24 }
 0x12b   : > { %p1504_p1 = pnand %p1507_p0, %p1723_p8 }
 0x12d   : > { %p1505_p2 = pneg %p1504_p1 }
 0x12f   : > { %1614 = dma.done.wait (%p1505_p2), %s1402_s27, 512  }
 0x130   : > { %1616 = vsyncadd (%p1505_p2), %s1402_s27, 4294966784  ;;  %s18_s23 = sadd.s32 1, %s1639_s23   ;;  %s1909_s18 = smov %s1623_s19 }
 0x131   : > { %p15_p3 = scmp.ge.s32.totalorder %s18_s23, 4   ;;  %s1910_s19 = smov %s1627_s20 }
 0x132   : > { %s1911_s20 = smov %s1729_s6  ;;  %s1912_s21 = smov %s1635_s22 }
 0x133   : > { %s1913_s22 = smov %s1915_s26  ;;  %17 = sbr.rel (!%p15_p3) target bundleno = 4 (0x4), region = 78 }
 0x138   :  { %1407 = vsyncpa [#allocation3], 1 }
 0x139   :  { %1409 = vsyncpa [#allocation3 + $0x1], 1 }

</bundles_post_ra>
